<compile_context>
chip_gen: v7x
topology: tpu7x:2x2x1
jax: 0.10.0
libtpu: 0.0.40
codegen_flags: <defaults>
</compile_context>

<pallas_src>
import functools

import jax
import jax.numpy as jnp
from jax.experimental import pallas as pl
from jax.experimental.pallas import tpu as pltpu


def _chip_info():
    """Returns (vmem_capacity_bytes, multi_tensorcore) with safe fallbacks."""
    vmem_cap = 64 << 20          # v7x's 64 MiB is the safe minimum assumption
    multi_tc = False
    try:
        info = pltpu.get_tpu_info()
        vmem_cap = int(getattr(info, "vmem_capacity_bytes", vmem_cap))
    except Exception:
        pass
    try:
        kind = jax.devices()[0].device_kind.lower()
        if "v7" in kind:         # v7x: 2 TensorCores/chip; v5e/v6e: 1
            multi_tc = True
    except Exception:
        pass
    return vmem_cap, multi_tc


def _kernel_small_c(c, x_ref, w_ref, b_ref, o_ref):
    # Tiny-C path: an MXU tile would be >97% padding, so do the 1x1 conv on
    # the VPU as C broadcast multiply-adds (no (C,T) MXU temp, no push/pop).
    # x_ref: (C, T), w_ref: (C, C), b_ref: (C, 1), o_ref: (C, T)
    x = x_ref[...]
    w = w_ref[...]
    acc = w[:, 0:1] * x[0:1, :]
    for k in range(1, c):
        acc = acc + w[:, k:k + 1] * x[k:k + 1, :]
    o_ref[...] = x + acc + b_ref[...]


def _kernel_mxu(use_bf16, x_ref, w_ref, b_ref, o_ref):
    # x_ref: (C, T)   one batch element's channels x spatial tile (T on lanes)
    # w_ref: (C, C)   gamma-folded 1x1 conv weight (bf16 when use_bf16)
    # b_ref: (C, 1)   gamma-folded conv bias (f32)
    # o_ref: (C, T)
    x = x_ref[...]
    rhs = x.astype(jnp.bfloat16) if use_bf16 else x
    y = jnp.dot(w_ref[...], rhs, preferred_element_type=jnp.float32)   # MXU
    o_ref[...] = x + y + b_ref[...]


def _pick_tile_hw(hw, c, n_batch, multi_tc, max_block_bytes):
    """Largest multiple of 128 dividing hw with C*T*4 <= max_block_bytes."""
    if hw % 128 != 0:
        return hw   # defensive only; wrapper pads hw to a 128-multiple
    cap = max(128, (max_block_bytes // (c * 4)) // 128 * 128)
    # Keep >= 2 grid points only on 2-TensorCore chips (v7x); on single-TC
    # chips halving the tile just doubles per-step overhead (mem-bound).
    if multi_tc and n_batch == 1 and hw >= 256:
        cap = max(128, min(cap, (hw // 2) // 128 * 128))
    t = min(hw, cap)
    while hw % t != 0:
        t -= 128
    return t


def residual_pallas(x_nchw, w_oi, bias, gamma):
    """x_nchw: [N, C, H, W] f32; w_oi: [C_out, C_in] (1x1 conv weight squeezed);
    bias: [C]; gamma: [C].  Returns [N, C, H, W] = x + gamma*(conv1x1(x)+b)."""
    N, C, H, W = x_nchw.shape
    HW = H * W

    vmem_cap, multi_tc = _chip_info()

    # NCHW viewed as (N, C, H*W) -- a free reshape, no transpose.
    x3 = x_nchw.reshape(N, C, HW)

    # Pad spatial once to a 128-multiple so stores stay unmasked / lane-dense.
    HW_pad = -(-HW // 128) * 128
    if HW_pad != HW:
        x3 = jnp.pad(x3, ((0, 0), (0, 0), (0, HW_pad - HW)))

    # Fold layer-scale gamma:  x + gamma*(W@x + b) == x + (gamma*W)@x + gamma*b
    use_bf16 = C >= 512
    w_dtype = jnp.bfloat16 if use_bf16 else jnp.float32
    w_g = (gamma[:, None] * w_oi).astype(w_dtype)             # (C_out, C_in)
    b_g = (gamma * bias).reshape(C, 1).astype(jnp.float32)    # (C, 1)

    tile_hw = _pick_tile_hw(HW_pad, C, N, multi_tc, max_block_bytes=8 << 20)
    n_hw = HW_pad // tile_hw
    grid = (N, n_hw)

    # VMEM budget: double-buffered x + double-buffered out + matmul temp
    # (5 blocks), double-buffered weight/bias, plus margin; capped at 75% of
    # the chip's physical VMEM (v7x 64 MiB -> 48 MiB, v5e/v6e 128 -> 96 MiB).
    blk_bytes = C * tile_hw * 4
    w_bytes = int(w_g.size) * w_g.dtype.itemsize
    vmem_bytes = 5 * blk_bytes + 2 * (w_bytes + C * 4) + (2 << 20)
    vmem_bytes = int(min(max(vmem_bytes, 16 << 20), (vmem_cap * 3) // 4))

    if C <= 16:
        kernel = functools.partial(_kernel_small_c, C)
    else:
        kernel = functools.partial(_kernel_mxu, use_bf16)

    out3 = pl.pallas_call(
        kernel,
        out_shape=jax.ShapeDtypeStruct((N, C, HW_pad), jnp.float32),
        grid_spec=pl.GridSpec(
            grid=grid,
            in_specs=[
                pl.BlockSpec((None, C, tile_hw), lambda n, j: (n, 0, j)),
                pl.BlockSpec((C, C), lambda n, j: (0, 0)),
                pl.BlockSpec((C, 1), lambda n, j: (0, 0)),
            ],
            out_specs=pl.BlockSpec((None, C, tile_hw), lambda n, j: (n, 0, j)),
        ),
        compiler_params=pltpu.CompilerParams(
            dimension_semantics=("parallel", "parallel"),
            vmem_limit_bytes=vmem_bytes,
        ),
    )(x3, w_g, b_g)

    if HW_pad != HW:
        out3 = out3[:, :, :HW]
    return out3.reshape(N, C, H, W)


if __name__ == "__main__":
    key = jax.random.PRNGKey(0)
    k_x, k_w, k_b = jax.random.split(key, 3)

    N, C, H, W = 2, 4, 16, 16
    layer_scale_init_value = 1e-2      # > 0 -> gamma path is active
    # drop_path = 0.0 -> DropPath is nn.Identity (eval semantics)

    x = jax.random.normal(k_x, (N, C, H, W), dtype=jnp.float32)
    # inner module m: Conv2d(C, C, kernel_size=1) weights (deterministic init)
    w_conv = jax.random.normal(k_w, (C, C), dtype=jnp.float32) * 0.1   # (C_out, C_in)
    b_conv = jax.random.normal(k_b, (C,), dtype=jnp.float32) * 0.1
    gamma = jnp.full((C,), layer_scale_init_value, dtype=jnp.float32)  # (1,dim,1,1) squeezed

    out = residual_pallas(x, w_conv, b_conv, gamma)
    out = jax.block_until_ready(out)

    # pure-JAX reference of the same forward: x + gamma * (conv1x1(x) + b)
    y_ref = jnp.einsum('nchw,oc->nohw', x, w_conv) + b_conv[None, :, None, None]
    ref = x + gamma[None, :, None, None] * y_ref

    assert out.shape == (N, C, H, W)
    assert jnp.allclose(out, ref, atol=1e-5, rtol=1e-5)
    print("KERNEL_OK")
</pallas_src>

<mosaic_0001>
module attributes {stable_mosaic.version = 11 : i64} {
  func.func @_kernel_small_c(%arg0: i32, %arg1: i32, %arg2: memref<1x4x256xf32, #tpu.memory_space<vmem>>, %arg3: memref<4x4xf32, #tpu.memory_space<vmem>>, %arg4: memref<4x1xf32, #tpu.memory_space<vmem>>, %arg5: memref<1x4x256xf32, #tpu.memory_space<vmem>>) attributes {dimension_semantics = [#tpu.dimension_semantics<parallel>, #tpu.dimension_semantics<parallel>], iteration_bounds = array<i64: 2, 1>, scalar_prefetch = 0 : i64, scratch_operands = 0 : i64, tpu.core_type = #tpu.core_type<tc>, window_params = [{transform_indices = @transform_0, window_bounds = array<i64: 1, 4, 256>}, {pipeline_mode = #tpu.pipeline_mode<synchronous>, transform_indices = @transform_1, window_bounds = array<i64: 4, 4>}, {pipeline_mode = #tpu.pipeline_mode<synchronous>, transform_indices = @transform_2, window_bounds = array<i64: 4, 1>}, {transform_indices = @transform_3, window_bounds = array<i64: 1, 4, 256>}]} {
    %c0 = arith.constant 0 : index
    %c0_0 = arith.constant 0 : index
    %c0_1 = arith.constant 0 : index
    %0 = vector.load %arg2[%c0, %c0_0, %c0_1] : memref<1x4x256xf32, #tpu.memory_space<vmem>>, vector<1x4x256xf32>
    %1 = vector.shape_cast %0 : vector<1x4x256xf32> to vector<4x256xf32>
    %c0_2 = arith.constant 0 : index
    %c0_3 = arith.constant 0 : index
    %2 = vector.load %arg3[%c0_2, %c0_3] : memref<4x4xf32, #tpu.memory_space<vmem>>, vector<4x4xf32>
    %3 = vector.extract_strided_slice %2 {offsets = [0, 0], sizes = [4, 1], strides = [1, 1]} : vector<4x4xf32> to vector<4x1xf32>
    %4 = vector.extract_strided_slice %1 {offsets = [0, 0], sizes = [1, 256], strides = [1, 1]} : vector<4x256xf32> to vector<1x256xf32>
    %5 = vector.broadcast %3 : vector<4x1xf32> to vector<4x256xf32>
    %6 = vector.broadcast %4 : vector<1x256xf32> to vector<4x256xf32>
    %7 = arith.mulf %5, %6 : vector<4x256xf32>
    %8 = vector.extract_strided_slice %2 {offsets = [0, 1], sizes = [4, 1], strides = [1, 1]} : vector<4x4xf32> to vector<4x1xf32>
    %9 = vector.extract_strided_slice %1 {offsets = [1, 0], sizes = [1, 256], strides = [1, 1]} : vector<4x256xf32> to vector<1x256xf32>
    %10 = vector.broadcast %8 : vector<4x1xf32> to vector<4x256xf32>
    %11 = vector.broadcast %9 : vector<1x256xf32> to vector<4x256xf32>
    %12 = arith.mulf %10, %11 : vector<4x256xf32>
    %13 = arith.addf %7, %12 : vector<4x256xf32>
    %14 = vector.extract_strided_slice %2 {offsets = [0, 2], sizes = [4, 1], strides = [1, 1]} : vector<4x4xf32> to vector<4x1xf32>
    %15 = vector.extract_strided_slice %1 {offsets = [2, 0], sizes = [1, 256], strides = [1, 1]} : vector<4x256xf32> to vector<1x256xf32>
    %16 = vector.broadcast %14 : vector<4x1xf32> to vector<4x256xf32>
    %17 = vector.broadcast %15 : vector<1x256xf32> to vector<4x256xf32>
    %18 = arith.mulf %16, %17 : vector<4x256xf32>
    %19 = arith.addf %13, %18 : vector<4x256xf32>
    %20 = vector.extract_strided_slice %2 {offsets = [0, 3], sizes = [4, 1], strides = [1, 1]} : vector<4x4xf32> to vector<4x1xf32>
    %21 = vector.extract_strided_slice %1 {offsets = [3, 0], sizes = [1, 256], strides = [1, 1]} : vector<4x256xf32> to vector<1x256xf32>
    %22 = vector.broadcast %20 : vector<4x1xf32> to vector<4x256xf32>
    %23 = vector.broadcast %21 : vector<1x256xf32> to vector<4x256xf32>
    %24 = arith.mulf %22, %23 : vector<4x256xf32>
    %25 = arith.addf %19, %24 : vector<4x256xf32>
    %26 = arith.addf %1, %25 : vector<4x256xf32>
    %c0_4 = arith.constant 0 : index
    %c0_5 = arith.constant 0 : index
    %27 = vector.load %arg4[%c0_4, %c0_5] : memref<4x1xf32, #tpu.memory_space<vmem>>, vector<4x1xf32>
    %28 = vector.broadcast %27 : vector<4x1xf32> to vector<4x256xf32>
    %29 = arith.addf %26, %28 : vector<4x256xf32>
    %c0_6 = arith.constant 0 : index
    %c0_7 = arith.constant 0 : index
    %c0_8 = arith.constant 0 : index
    %30 = vector.load %arg5[%c0_6, %c0_7, %c0_8] : memref<1x4x256xf32, #tpu.memory_space<vmem>>, vector<1x4x256xf32>
    %31 = vector.shape_cast %30 : vector<1x4x256xf32> to vector<4x256xf32>
    %32 = vector.shape_cast %29 : vector<4x256xf32> to vector<1x4x256xf32>
    tpu.vector_store %arg5[%c0_6, %c0_7, %c0_8], %32 {strides = array<i32>} : memref<1x4x256xf32, #tpu.memory_space<vmem>>, vector<1x4x256xf32>,
    return
  }
  func.func @transform_0(%arg0: i32, %arg1: i32) -> (i32, i32, i32) {
    %c0_i32 = arith.constant 0 : i32
    %c0_i32_0 = arith.constant 0 : i32
    return %arg0, %c0_i32, %arg1 : i32, i32, i32
  }
  func.func @transform_1(%arg0: i32, %arg1: i32) -> (i32, i32) {
    %c0_i32 = arith.constant 0 : i32
    %c0_i32_0 = arith.constant 0 : i32
    %c0_i32_1 = arith.constant 0 : i32
    return %c0_i32, %c0_i32_0 : i32, i32
  }
  func.func @transform_2(%arg0: i32, %arg1: i32) -> (i32, i32) {
    %c0_i32 = arith.constant 0 : i32
    %c0_i32_0 = arith.constant 0 : i32
    %c0_i32_1 = arith.constant 0 : i32
    return %c0_i32, %c0_i32_0 : i32, i32
  }
  func.func @transform_3(%arg0: i32, %arg1: i32) -> (i32, i32, i32) {
    %c0_i32 = arith.constant 0 : i32
    %c0_i32_0 = arith.constant 0 : i32
    return %arg0, %c0_i32, %arg1 : i32, i32, i32
  }
}

</mosaic_0001>

<bundles_post_ra>
// kernel: tpu_custom_call.1
= control target key start
LH: loop header
LB: loop body
LE: loop exit
PB: predicated region body
PF: predicated region fallthrough
CT: control target
= control target key end

     0   :  { %8 = vsyncpa [#allocation3], 0  ;;  %s847_s0 = inlined_call_operand.hbm [shape: f32[2,4,256], index: 0, kind: input, shape index: {}]   ;;  %s848_s1 = inlined_call_operand.vmem [shape: f32[4,4], index: 1, kind: input, shape index: {}]   ;;  %s849_s2 = inlined_call_operand.vmem [shape: f32[4,1], index: 2, kind: input, shape index: {}]   ;;  %s850_s3 = inlined_call_operand.hbm [shape: f32[2,4,256], index: 3, kind: output, shape index: {}]  }
   0x1   :  { %10 = vsyncpa [#allocation3 + $0x1], 0 }
   0x2   :  { %11 = vsyncpa [#allocation4], 0 }
   0x3   :  { %13 = vsyncpa [#allocation4 + $0x1], 0  ;;  %s665_s12 = smov 0   ;;  %s667_s13 = smov 0  }
   0x4   :  { %s669_s14 = smov 0   ;;  %s671_s15 = smov 0  }
   0x5   :  { %s673_s16 = smov 0   ;;  %s675_s17 = smov 0  }
   0x6 LB: > { %s434_s18 = sadd.s32 4294967295, %s636_s17   ;;  %s435_s19 = sadd.s32 4294967294, %s636_s17   ;;  %s636_s17 = sphi %s675_s17, %s19_s17   ;;  %s632_s16 = sphi %s673_s16, %s866_s16   ;;  %s628_s15 = sphi %s671_s15, %s865_s15   ;;  %s624_s14 = sphi %s669_s14, %s864_s14   ;;  %s620_s13 = sphi %s667_s13, %s863_s13   ;;  %s616_s12 = sphi %s665_s12, %s862_s12  }
   0x7   : > { %s31_s20 = sadd.s32 1, %s632_s16  ;;  %s40_s21 = sadd.s32 1, %s624_s14 }
   0x8   : > { %p33_p0 = scmp.ge.s32.totalorder %s31_s20, 2  ;;  %p47_p1 = scmp.ne.s32.totalorder %s624_s14, %s620_s13 }
   0x9   : > { %p48_p2 = scmp.eq.s32.totalorder %s636_s17, 0  ;;  %p53_p3 = scmp.ne.s32.totalorder %s620_s13, %s616_s12 }
   0xa   : > { %s868_s20 = smov (%p33_p0, %s31_s20), 0  ;;  %p54_p5 = scmp.eq.s32.totalorder %s434_s18, 0 }
   0xb   : > { %p706_p4 = por %p48_p2, %p47_p1  ;;  %s35_s23 = ssub.s32 %s632_s16, %s868_s20 }
   0xc   : > { %p121_p6 = scmp.eq.s32.totalorder %s434_s18, 1  ;;  %p38_p7 = scmp.eq.s32.totalorder %s35_s23, 0 }
   0xd   : > { %p712_p8 = por %p54_p5, %p53_p3  ;;  %p127_p10 = scmp.eq.s32.totalorder %s435_s19, 1 }
   0xe   : > { %p716_p9 = por %p121_p6, %p47_p1  ;;  %p463_p13 = scmp.lt.s32.totalorder %s636_s17, 2 }
   0xf   : > { %s721_s26 = scalar_select %p38_p7, %s624_s14, %s40_s21  }
  0x10   : > { %s854_s25 = scalar_select %p716_p9, 1, 0 }
  0x11   : > { %p723_p11 = por %p127_p10, %p53_p3  ;;  %s153_s28 = sand.u32 1, %s624_s14  }
  0x12   : > { %s438_s29 = sshll.u32 %s153_s28, 3  ;;  %s449_s30 = sshll.u32 %s632_s16, 7 }
  0x13   : > { %s855_s27 = scalar_select %p723_p11, 1, 0 }
  0x14   : > { %s734_s6 = scalar_lea.hbm %s847_s0, %s449_s30  ;;  %s157_s7 = scalar_lea.vmem [#allocation2], %s438_s29 }
  0x15   : > { %s167_s8 = sshll.u32 %s157_s7, 4  ;;  %p740_p0 = pnand %p463_p13, %p706_p4  ;;  %s736_s8 = int_to_ptr.vmem [resolvable:$true] %s167_s8 }
  0x16   : > { %s154_s10 = scalar_lea.sflag [#allocation3], %s153_s28  ;;  %s524_s11 = scalar_lea.hbm %s734_s6, 128 }
  0x17   : > { %p525_p3 = scmp.ne.s32.totalorder %s734_s6, %s524_s11  ;;  %p526_p5 = pneg %p740_p0 }
  0x18   : > { %s529_s21 = scalar_lea.hbm %s847_s0, 256  ;;  %p530_p4 = scmp.lt.u32.totalorder %s734_s6, %s847_s0 }
  0x19   : > { %p527_p6 = pnand %p526_p5, %p525_p3  ;;  %p531_p10 = scmp.lt.u32.totalorder %s529_s21, %s524_s11 }
  0x1a   : > { %p533_p12 = scmp.lt.u32.totalorder %s524_s11, %s734_s6 }
  0x1b   : > { %p528_p7 = pneg %p527_p6  ;;  %p532_p13 = por %p531_p10, %p530_p4 }
  0x1d   : > { %p534_p1 = por %p533_p12, %p532_p13 }
  0x1f   : > { %p535_p2 = pnand %p534_p1, %p528_p7 }
  0x21   : > { %538 = shalt.err (!%p535_p2)
}
  0x22   : > { %s539_s28 = scalar_lea.vmem %s736_s8, 128  ;;  %s638_s29 = smov [#allocation2]  }
  0x23   : > { %p540_p3 = scmp.ne.s32.totalorder %s736_s8, %s539_s28  ;;  %s544_s30 = sshll.u32 %s638_s29, 4  ;;  %s545_s30 = int_to_ptr.vmem [resolvable:$false] %s544_s30 }
  0x24   : > { %s546_s4 = scalar_lea.vmem %s545_s30, 256  ;;  %p547_p9 = scmp.lt.s32.totalorder %s736_s8, %s545_s30 }
  0x25   : > { %p542_p6 = pnand %p540_p3, %p526_p5  ;;  %p548_p4 = scmp.lt.s32.totalorder %s546_s4, %s539_s28 }
  0x27   : > { %p543_p11 = pneg %p542_p6  ;;  %p549_p10 = por %p548_p4, %p547_p9 }
  0x29   : > { %p550_p12 = pnand %p549_p10, %p543_p11 }
  0x2b   : > { %553 = shalt.err (!%p550_p12)
}
  0x2c   : > { %458 = dma.hbm_to_vmem [thread:$0]  (!%p740_p0), %s734_s6, 128, %s736_s8, %s154_s10  }
  0x2d   : > { %p857_p1 = scmp.lt.s32.totalorder %s636_s17, 3  ;;  %p858_p2 = scmp.ge.s32.totalorder %s636_s17, 1 }
  0x2f   : > { %p173_p5 = pnand %p858_p2, %p857_p1 }
  0x30   : > { %s776_s5 = sand.u32 (!%p173_p5), 1, %s620_s13  }
  0x31   : > { %176 = sbr.rel (%p173_p5) target bundleno = 220 (0xdc), region = 32  ;;  %s442_s7 = sshll.u32 (!%p173_p5), %s776_s5, 3 }
  0x32   : > { %s179_s11 = scalar_lea.sflag (!%p173_p5), [#allocation3], %s776_s5  ;;  %s182_s9 = scalar_lea.vmem (!%p173_p5), [#allocation2], %s442_s7 }
  0x38   : > { %607 = dma.done.wait (%p712_p8), %s179_s11, 128  }
  0x39   : > { %609 = vsyncadd (%p712_p8), %s179_s11, 4294967168  ;;  %v639_v0 = vmov 0   ;;  %v640_v1 = vmov 2   ;;  %v208_v2 = vld [vmem:[%s848_s1] sm:$0xf]  ;;  %v641_v3 = vmov 1   ;;  %v215_v6 = vlaneseq }
  0x3a   : > { %518 = vset.pattern.permute.xlu0 %v639_v0  ;;  %520 = vset.pattern.permute.xlu1 %v640_v1  ;;  %v642_v4 = vmov 3   ;;  %v318_v5 = vld [vmem:[%s849_s2] sm:$0xf]  ;;  %v643_v27 = vmov 839922192   ;;  %s450_s24 = sshll.u32 %s628_s15, 7 }
  0x3b   : > { %211 = vperm.xlu0 %518, %v208_v2   ;;  %262 = vperm.xlu1 %520, %v208_v2   ;;  %v216_v7 = vshrl.u32 %v215_v6, 7  ;;  %v207_v10 = vld [vmem:[%s182_s9] sm:$0xff]  ;;  %v324_v28 = vunpack.c.l.s4 %v643_v27  ;;  %s204_s19 = scalar_lea.vmem [#allocation5], %s442_s7  ;;  %s798_s28 = scalar_lea.hbm %s850_s3, %s450_s24 }
  0x3c   : > { %s350_s21 = sshll.u32 %s204_s19, 4  ;;  %s334_s29 = scalar_lea.sflag [#allocation4], %s776_s5  ;;  %s800_s21 = int_to_ptr.vmem [resolvable:$true] %s350_s21 }
  0x3d   : > { %v217_v8 = vsub.s32 0, %v216_v7  ;;  %v221_v9 = vsub.s32 4, %v216_v7  ;;  %v241_v11 = vsub.s32 1, %v216_v7  ;;  %v245_v12 = vsub.s32 5, %v216_v7  ;;  %s554_s30 = scalar_lea.vmem %s800_s21, 128  ;;  %p859_p9 = scmp.ne.s32.totalorder %s854_s25, 0 }
  0x3e   : > { %v267_v13 = vsub.s32 2, %v216_v7  ;;  %v271_v14 = vsub.s32 6, %v216_v7  ;;  %v293_v15 = vsub.s32 3, %v216_v7  ;;  %v297_v16 = vsub.s32 7, %v216_v7  ;;  %p555_p8 = scmp.ne.s32.totalorder %s800_s21, %s554_s30  ;;  %s644_s15 = smov [#allocation5]  }
  0x3f   : > { %519 = vset.pattern.permute.xlu0 %v641_v3  ;;  %521 = vset.pattern.permute.xlu1 %v642_v4  ;;  %v218_v17 = vrot.slane %v207_v10, %v217_v8  ;;  %v222_v18 = vrot.slane %v207_v10, %v221_v9  ;;  %v242_v19 = vrot.slane %v207_v10, %v241_v11  ;;  %v325_v39 = vunpack.c.0.s8 %v324_v28  ;;  %s558_s4 = sshll.u32 %s644_s15, 4  ;;  %s559_s4 = int_to_ptr.vmem [resolvable:$false] %s558_s4 }
  0x40   : > { %236 = vperm.xlu0 %519, %v208_v2   ;;  %288 = vperm.xlu1 %521, %v208_v2   ;;  %v246_v20 = vrot.slane %v207_v10, %v245_v12  ;;  %v268_v21 = vrot.slane %v207_v10, %v267_v13  ;;  %v272_v22 = vrot.slane %v207_v10, %v271_v14  ;;  %p556_p11 = pnand %p555_p8, %p859_p9  ;;  %s560_s7 = scalar_lea.vmem %s559_s4, 256 }
  0x41   : > { %v294_v25 = vrot.slane %v207_v10, %v293_v15  ;;  %v298_v26 = vrot.slane %v207_v10, %v297_v16  ;;  %v228_v29 = vrot.slane %v218_v17, %v217_v8  ;;  %v232_v30 = vrot.slane %v222_v18, %v217_v8  ;;  %p561_p7 = scmp.lt.s32.totalorder %s800_s21, %s559_s4  ;;  %p562_p13 = scmp.lt.s32.totalorder %s560_s7, %s554_s30 }
  0x42   : > { %v252_v31 = vrot.slane %v242_v19, %v241_v11  ;;  %v256_v32 = vrot.slane %v246_v20, %v241_v11  ;;  %v278_v33 = vrot.slane %v268_v21, %v267_v13  ;;  %v282_v34 = vrot.slane %v272_v22, %v267_v13  ;;  %p557_p0 = pneg %p556_p11 }
  0x43   : > { %v304_v35 = vrot.slane %v294_v25, %v293_v15  ;;  %v308_v36 = vrot.slane %v298_v26, %v293_v15  ;;  %v328_v52 = vsub.s32 %v325_v39, %v216_v7  ;;  %p563_p3 = por %p562_p13, %p561_p7 }
  0x44   : > { %522 = vset.pattern.permute.xlu1 %v639_v0  ;;  %523 = vset.pattern.permute.xlu0 %v639_v0 }
  0x45   : > { %321 = vperm.xlu1 %522, %v318_v5   ;;  %p564_p6 = pnand %p563_p3, %p557_p0 }
  0xba   : > { %v212_v23 = vpop.permute.xlu0 %211  ;;  %v263_v24 = vpop.permute.xlu1 %262 }
  0xbb   : > { %v233_v40 = vmul.f32 %v228_v29, %v212_v23  ;;  %v234_v41 = vmul.f32 %v232_v30, %v212_v23  ;;  %v283_v44 = vmul.f32 %v278_v33, %v263_v24  ;;  %v284_v45 = vmul.f32 %v282_v34, %v263_v24 }
  0xbf   : > { %v237_v37 = vpop.permute.xlu0 %236  ;;  %v289_v38 = vpop.permute.xlu1 %288 }
  0xc0   : > { %v257_v42 = vmul.f32 %v252_v31, %v237_v37  ;;  %v258_v43 = vmul.f32 %v256_v32, %v237_v37  ;;  %v309_v48 = vmul.f32 %v304_v35, %v289_v38  ;;  %v310_v49 = vmul.f32 %v308_v36, %v289_v38 }
  0xc2   : > { %v259_v46 = vadd.f32 %v257_v42, %v233_v40  ;;  %v260_v47 = vadd.f32 %v258_v43, %v234_v41 }
  0xc4   : > { %v285_v50 = vadd.f32 %v283_v44, %v259_v46  ;;  %v286_v51 = vadd.f32 %v284_v45, %v260_v47  ;;  %v322_v53 = vpop.permute.xlu1 %321 }
  0xc5   : > { %v329_v57 = vrot.slane %v322_v53, %v328_v52 }
  0xc6   : > { %v311_v54 = vadd.f32 %v309_v48, %v285_v50  ;;  %v312_v55 = vadd.f32 %v310_v49, %v286_v51 }
  0xc8   : > { %v315_v56 = vcombine.low %v311_v54, %v312_v55 }
  0xca   : > { %v317_v58 = vadd.f32 %v315_v56, %v207_v10 }
  0xcc   : > { %v331_v59 = vadd.f32 %v329_v57, %v317_v58 }
  0xce   : > { %332 = vst [vmem:[%s204_s19] sm:$0xff] %v331_v59 }
  0xcf   : > { %567 = shalt.err (!%p564_p6)
}
  0xd0   : > { %s568_s5 = scalar_lea.hbm %s798_s28, 128  ;;  %s572_s6 = scalar_lea.hbm %s850_s3, 256 }
  0xd1   : > { %p569_p4 = scmp.ne.s32.totalorder %s798_s28, %s568_s5  ;;  %p573_p1 = scmp.lt.u32.totalorder %s798_s28, %s850_s3 }
  0xd2   : > { %p574_p2 = scmp.lt.u32.totalorder %s572_s6, %s568_s5  ;;  %p576_p8 = scmp.lt.u32.totalorder %s568_s5, %s798_s28 }
  0xd3   : > { %p570_p10 = pnand %p569_p4, %p859_p9 }
  0xd4   : > { %p575_p5 = por %p574_p2, %p573_p1 }
  0xd5   : > { %p571_p12 = pneg %p570_p10 }
  0xd6   : > { %p577_p11 = por %p576_p8, %p575_p5 }
  0xd8   : > { %p578_p0 = pnand %p577_p11, %p571_p12 }
  0xda   : > { %581 = shalt.err (!%p578_p0)
}
  0xdb   : > { %453 = dma.vmem_to_hbm [thread:$0]  (%p859_p9), %s800_s21, 128, %s798_s28, %s334_s29  }
  0xdc PF: > { %s362_s18 = sand.u32 1, %s616_s12   ;;  %p860_p7 = scmp.ne.s32.totalorder %s855_s27, 0 }
  0xdd   : > { %p861_p13 = scmp.ge.s32.totalorder %s636_s17, 2  ;;  %s363_s24 = scalar_lea.sflag [#allocation4], %s362_s18 }
  0xdf   : > { %p460_p3 = pnand %p861_p13, %p860_p7 }
  0xe1   : > { %611 = dma.done.wait (!%p460_p3), %s363_s24, 128  }
  0xe2   : > { %613 = vsyncadd (!%p460_p3), %s363_s24, 4294967168  ;;  %s19_s17 = sadd.s32 1, %s636_s17   ;;  %s862_s12 = smov %s620_s13 }
  0xe3   : > { %p16_p6 = scmp.ge.s32.totalorder %s19_s17, 4   ;;  %s863_s13 = smov %s624_s14 }
  0xe4   : > { %s864_s14 = smov %s721_s26  ;;  %s865_s15 = smov %s632_s16 }
  0xe5   : > { %s866_s16 = smov %s868_s20  ;;  %18 = sbr.rel (!%p16_p6) target bundleno = 6 (0x6), region = 77 }
  0xec   :  { %368 = vsyncpa [#allocation3], 1 }
  0xed   :  { %370 = vsyncpa [#allocation3 + $0x1], 1 }
  0xee   :  { %371 = vsyncpa [#allocation4], 1 }
  0xef   :  { %373 = vsyncpa [#allocation4 + $0x1], 1 }

</bundles_post_ra>
